<compile_context>
chip_gen: v7x
topology: tpu7x:2x2x1
jax: 0.10.0
libtpu: 0.0.40
codegen_flags: <defaults>
</compile_context>

<pallas_src>
import functools

import jax
import jax.numpy as jnp
from jax import lax
from jax.experimental import pallas as pl
from jax.experimental.pallas import tpu as pltpu


# ----------------------------- kernel helpers -----------------------------
def _softmax_parts(x):
    """Return (x - max, exp(x - max), sum(exp(x - max))) along the last axis.

    log_softmax(x) == (x - max) - log(sum); the full log_softmax matrix is
    never materialized (saves one (tb, C) VPU pass per stream)."""
    m = jnp.max(x, axis=-1, keepdims=True)
    xm = x - m
    e = jnp.exp(xm)
    s = jnp.sum(e, axis=-1, keepdims=True)
    return xm, e, s


def _ce_sum(xm, s, picked_xm):
    """sum over rows of -log_softmax[row, picked] given parts of softmax.

    picked_xm = jnp.where(col == picked, xm, 0.0) computed by the caller."""
    return jnp.sum(jnp.log(s)) - jnp.sum(picked_xm)


def _write_partial(part_ref, value):
    # Lane-dense unmasked (1, 8, 128) store of the block's partial loss; the
    # wrapper reads [:, 0, 0].
    part_ref[...] = jnp.full(part_ref.shape, value, dtype=jnp.float32)


def _block_labels(lbl_ref, tb):
    """Slice this block's labels out of the VMEM-resident (B, 1) label array."""
    start = pl.multiple_of(pl.program_id(0) * tb, tb)
    return lbl_ref[pl.ds(start, tb), :]


# ------------------------------- kernels -----------------------------------
def _kernel_none(out_ref, lbl_ref, part_ref, *, base_scale):
    out = out_ref[...].astype(jnp.float32)          # (TB, C)
    tb, c = out.shape
    lbl = _block_labels(lbl_ref, tb)                # (TB, 1) int32
    col = lax.broadcasted_iota(jnp.int32, (tb, c), 1)

    xm, _, s = _softmax_parts(out)
    base_sum = _ce_sum(xm, s, jnp.where(col == lbl, xm, 0.0))
    _write_partial(part_ref, base_sum * base_scale)


def _kernel_soft(out_ref, kd_ref, tch_ref, lbl_ref, part_ref, *,
                 base_scale, dist_scale, inv_tau):
    # Streams are consumed one at a time (out -> kd -> teacher) so the peak
    # live f32 working set stays ~2-3 (TB, C) arrays.
    out = out_ref[...].astype(jnp.float32)
    tb, c = out.shape
    lbl = _block_labels(lbl_ref, tb)
    col = lax.broadcasted_iota(jnp.int32, (tb, c), 1)

    xm_o, _, s_o = _softmax_parts(out)
    base_sum = _ce_sum(xm_o, s_o, jnp.where(col == lbl, xm_o, 0.0))

    # Student (kd) branch at temperature T.
    xm_s, _, s_s = _softmax_parts(kd_ref[...].astype(jnp.float32) * inv_tau)

    # Teacher branch at temperature T.
    xm_t, e_t, s_t = _softmax_parts(tch_ref[...].astype(jnp.float32) * inv_tau)

    # KL(log_target=True, reduction='sum'):
    #   sum_r sum_c p_t * (log p_t - log p_s)
    # = sum_r [ sum_c e_t * (xm_t - xm_s) / s_t + log(s_s) - log(s_t) ]
    # (uses sum_c p_t = 1; never materializes lt / ls.)
    row_dot = jnp.sum(e_t * (xm_t - xm_s), axis=-1, keepdims=True)
    kl_sum = jnp.sum(row_dot / s_t + jnp.log(s_s) - jnp.log(s_t))

    _write_partial(part_ref, base_sum * base_scale + kl_sum * dist_scale)


def _kernel_hard(out_ref, kd_ref, tch_ref, lbl_ref, part_ref, *,
                 base_scale, dist_scale):
    out = out_ref[...].astype(jnp.float32)
    tb, c = out.shape
    lbl = _block_labels(lbl_ref, tb)
    col = lax.broadcasted_iota(jnp.int32, (tb, c), 1)

    xm_o, _, s_o = _softmax_parts(out)
    base_sum = _ce_sum(xm_o, s_o, jnp.where(col == lbl, xm_o, 0.0))

    # Teacher argmax (first-max tie-break, matching jnp argmax).
    tch = tch_ref[...].astype(jnp.float32)
    tmax = jnp.max(tch, axis=-1, keepdims=True)
    first = jnp.min(jnp.where(tch == tmax, col, c), axis=-1, keepdims=True)

    xm_k, _, s_k = _softmax_parts(kd_ref[...].astype(jnp.float32))
    hard_sum = _ce_sum(xm_k, s_k, jnp.where(col == first, xm_k, 0.0))

    _write_partial(part_ref, base_sum * base_scale + hard_sum * dist_scale)


# ------------------------------- wrapper ------------------------------------
def _vmem_limit_bytes():
    """Generation-aware VMEM limit: ~48 MiB on v7x (64 MiB/TC physical),
    up to 64 MiB on v5e/v6e (128 MiB physical)."""
    cap = 64 * 1024 * 1024
    try:
        info = pltpu.get_tpu_info()
        cap = int(getattr(info, "vmem_capacity_bytes", cap) or cap)
    except Exception:
        pass
    return int(max(32 * 1024 * 1024,
                   min(cap - 16 * 1024 * 1024, 64 * 1024 * 1024)))


def _pick_block_rows(batch, n_logit_streams, itemsize, num_classes, vmem_budget):
    """Pick the tile height (rows per grid step).

    Goals, in order:
      * double-buffered native-dtype input tiles + ~6 (tb, C) f32 in-kernel
        intermediates fit `vmem_budget`
      * >= 4 grid steps when the batch allows (DMA/compute overlap), never a
        single block if a 2-way split is possible
      * an even number of blocks (even sharding across v7x's 2 TensorCores)
      * otherwise the largest tile (fewer per-step overheads).
    """
    per_row = (2 * n_logit_streams * itemsize + 6 * 4) * num_classes + 64
    cap = max(8, (vmem_budget // per_row) // 8 * 8)

    divisors = [d for d in range(8, batch + 1, 8) if batch % d == 0]
    if not divisors:
        return batch                                 # tiny / odd batch: one block
    max_blocks = batch // divisors[0]
    min_blocks = 4 if max_blocks >= 4 else (2 if max_blocks >= 2 else 1)

    best_key, best_tb = None, None
    for d in divisors:
        nb = batch // d
        if d > cap or nb < min_blocks:
            continue
        key = ((nb % 2) == 0, d)                     # prefer even #blocks, then size
        if best_key is None or key > best_key:
            best_key, best_tb = key, d
    if best_tb is not None:
        return best_tb
    fits = [d for d in divisors if d <= cap]
    return max(fits) if fits else divisors[0]


def distillation_loss(outputs, outputs_kd, labels, teacher_outputs, *,
                      distillation_type='soft', alpha=0.5, tau=1.0,
                      block_rows=None):
    """JAX wrapper mirroring DistillationLoss_rank.forward.

    outputs, outputs_kd, teacher_outputs: (B, C) logits (any float dtype)
    labels: (B,) int class indices
    Returns a scalar float32 loss.
    """
    assert distillation_type in ('none', 'soft', 'hard')
    B, C = outputs.shape
    labels2d = labels.astype(jnp.int32).reshape(B, 1)

    if distillation_type == 'none':
        logit_inputs = (outputs,)
        kernel = functools.partial(_kernel_none, base_scale=1.0 / B)
    elif distillation_type == 'soft':
        logit_inputs = (outputs, outputs_kd, teacher_outputs)
        kernel = functools.partial(
            _kernel_soft,
            base_scale=(1.0 - float(alpha)) / B,
            dist_scale=float(alpha) * (float(tau) * float(tau)) / (B * C),
            inv_tau=1.0 / float(tau))
    else:  # 'hard'
        logit_inputs = (outputs, outputs_kd, teacher_outputs)
        kernel = functools.partial(
            _kernel_hard,
            base_scale=(1.0 - float(alpha)) / B,
            dist_scale=float(alpha) / B)

    vmem_limit = _vmem_limit_bytes()
    itemsize = max(jnp.dtype(x.dtype).itemsize for x in logit_inputs)
    tb = block_rows if block_rows is not None else _pick_block_rows(
        B, len(logit_inputs), itemsize, C, vmem_budget=int(vmem_limit * 0.6))
    assert B % tb == 0, (B, tb)
    num_blocks = B // tb

    logit_spec = pl.BlockSpec((tb, C), lambda i: (i, 0))       # C whole on lanes
    # Labels stay VMEM-resident across all grid steps (constant index_map ->
    # copied once, no per-step DMA); kernels slice their rows with pl.ds.
    label_spec = pl.BlockSpec((B, 1), lambda i: (0, 0))
    in_specs = [logit_spec] * len(logit_inputs) + [label_spec]

    out_spec = pl.BlockSpec((1, 8, 128), lambda i: (i, 0, 0))
    out_shape = jax.ShapeDtypeStruct((num_blocks, 8, 128), jnp.float32)

    partials = pl.pallas_call(
        kernel,
        grid=(num_blocks,),
        in_specs=in_specs,
        out_specs=out_spec,
        out_shape=out_shape,
        compiler_params=pltpu.CompilerParams(
            dimension_semantics=("parallel",),
            vmem_limit_bytes=vmem_limit),
    )(*logit_inputs, labels2d)

    # Per-block partials already include all static scales; just sum them.
    return jnp.sum(partials[:, 0, 0])


# ---- pure-JAX reference for a correctness sanity check ----
def _reference(outputs, outputs_kd, labels, teacher_outputs,
               distillation_type, alpha, tau):
    outputs = outputs.astype(jnp.float32)
    outputs_kd = outputs_kd.astype(jnp.float32)
    teacher_outputs = teacher_outputs.astype(jnp.float32)
    B, C = outputs.shape
    logp = jax.nn.log_softmax(outputs, axis=1)
    base = -jnp.mean(jnp.take_along_axis(logp, labels[:, None], axis=1))
    if distillation_type == 'none':
        return base
    if distillation_type == 'soft':
        T = tau
        ls = jax.nn.log_softmax(outputs_kd / T, axis=1)
        lt = jax.nn.log_softmax(teacher_outputs / T, axis=1)
        distill = jnp.sum(jnp.exp(lt) * (lt - ls)) * (T * T) / (B * C)
    else:
        hard = jnp.argmax(teacher_outputs, axis=1)
        logp_kd = jax.nn.log_softmax(outputs_kd, axis=1)
        distill = -jnp.mean(jnp.take_along_axis(logp_kd, hard[:, None], axis=1))
    return base * (1.0 - alpha) + distill * alpha


if __name__ == "__main__":
    RTOL = ATOL = 1e-4

    # Config 1: small f32 logits, single block, all three distillation types.
    key = jax.random.PRNGKey(0)
    B, C = 8, 128
    k1, k2, k3, k4 = jax.random.split(key, 4)
    outputs = jax.random.normal(k1, (B, C), jnp.float32)
    outputs_kd = jax.random.normal(k2, (B, C), jnp.float32)
    teacher_outputs = jax.random.normal(k3, (B, C), jnp.float32)
    labels = jax.random.randint(k4, (B,), 0, C)

    alpha, tau = 0.5, 3.0
    for dt in ('none', 'soft', 'hard'):
        got = distillation_loss(outputs, outputs_kd, labels, teacher_outputs,
                                distillation_type=dt, alpha=alpha, tau=tau)
        got = jax.block_until_ready(got)
        want = _reference(outputs, outputs_kd, labels, teacher_outputs,
                          dt, alpha, tau)
        assert jnp.allclose(got, want, rtol=RTOL, atol=ATOL), (dt, got, want)

    # Config 2: bf16 logits kept in native dtype, explicit 2-block grid.
    B2, C2 = 16, 256
    k5, k6, k7, k8 = jax.random.split(jax.random.PRNGKey(1), 4)
    out2 = jax.random.normal(k5, (B2, C2), jnp.float32).astype(jnp.bfloat16)
    kd2 = jax.random.normal(k6, (B2, C2), jnp.float32).astype(jnp.bfloat16)
    tch2 = jax.random.normal(k7, (B2, C2), jnp.float32).astype(jnp.bfloat16)
    lbl2 = jax.random.randint(k8, (B2,), 0, C2)
    for dt in ('soft', 'hard'):
        got = distillation_loss(out2, kd2, lbl2, tch2,
                                distillation_type=dt, alpha=0.3, tau=2.0,
                                block_rows=8)
        got = jax.block_until_ready(got)
        want = _reference(out2, kd2, lbl2, tch2, dt, 0.3, 2.0)
        assert jnp.allclose(got, want, rtol=RTOL, atol=ATOL), (dt, got, want)

    # Config 3: C=1000 (non-multiple of 128 -> masked lane tail), heuristic
    # tiling picks a multi-step grid (B=32 -> 4 blocks of 8 rows).
    B3, C3 = 32, 1000
    k9, k10, k11, k12 = jax.random.split(jax.random.PRNGKey(2), 4)
    out3 = jax.random.normal(k9, (B3, C3), jnp.float32)
    kd3 = jax.random.normal(k10, (B3, C3), jnp.float32)
    tch3 = jax.random.normal(k11, (B3, C3), jnp.float32)
    lbl3 = jax.random.randint(k12, (B3,), 0, C3)
    for dt in ('soft', 'hard'):
        got = distillation_loss(out3, kd3, lbl3, tch3,
                                distillation_type=dt, alpha=0.5, tau=3.0)
        got = jax.block_until_ready(got)
        want = _reference(out3, kd3, lbl3, tch3, dt, 0.5, 3.0)
        assert jnp.allclose(got, want, rtol=RTOL, atol=ATOL), (dt, got, want)

    print("KERNEL_OK")
</pallas_src>

<mosaic_0001>
module attributes {stable_mosaic.version = 11 : i64} {
  func.func @_kernel_none(%arg0: i32, %arg1: memref<8x128xf32, #tpu.memory_space<vmem>>, %arg2: memref<8x1xi32, #tpu.memory_space<vmem>>, %arg3: memref<1x8x128xf32, #tpu.memory_space<vmem>>) attributes {dimension_semantics = [#tpu.dimension_semantics<parallel>], iteration_bounds = array<i64: 1>, scalar_prefetch = 0 : i64, scratch_operands = 0 : i64, tpu.core_type = #tpu.core_type<tc>, window_params = [{transform_indices = @transform_0, window_bounds = array<i64: 8, 128>}, {pipeline_mode = #tpu.pipeline_mode<synchronous>, transform_indices = @transform_1, window_bounds = array<i64: 8, 1>}, {transform_indices = @transform_2, window_bounds = array<i64: 1, 8, 128>}]} {
    %c0 = arith.constant 0 : index
    %c0_0 = arith.constant 0 : index
    %0 = vector.load %arg1[%c0, %c0_0] : memref<8x128xf32, #tpu.memory_space<vmem>>, vector<8x128xf32>
    %c8_i32 = arith.constant 8 : i32
    %1 = arith.muli %arg0, %c8_i32 : i32
    %2 = tpu.assume_multiple %1, 8 : i32
    %3 = arith.index_cast %2 : i32 to index
    %c0_1 = arith.constant 0 : index
    %4 = vector.load %arg2[%3, %c0_1] : memref<8x1xi32, #tpu.memory_space<vmem>>, vector<8x1xi32>
    %5 = tpu.iota {dimensions = array<i32: 1>} : vector<8x128xi32>
    %cst = arith.constant dense<0xFF800000> : vector<8xf32>
    %6 = vector.multi_reduction <maximumf>, %0, %cst [1] : vector<8x128xf32> to vector<8xf32>
    %7 = vector.shape_cast %6 : vector<8xf32> to vector<8x1xf32>
    %8 = vector.broadcast %7 : vector<8x1xf32> to vector<8x128xf32>
    %9 = arith.subf %0, %8 : vector<8x128xf32>
    %10 = math.exp %9 : vector<8x128xf32>
    %cst_2 = arith.constant dense<0.000000e+00> : vector<8xf32>
    %11 = vector.multi_reduction <add>, %10, %cst_2 [1] : vector<8x128xf32> to vector<8xf32>
    %12 = vector.shape_cast %11 : vector<8xf32> to vector<8x1xf32>
    %13 = vector.broadcast %4 : vector<8x1xi32> to vector<8x128xi32>
    %14 = arith.cmpi eq, %5, %13 : vector<8x128xi32>
    %cst_3 = arith.constant 0.000000e+00 : f32
    %15 = vector.broadcast %cst_3 : f32 to vector<8x128xf32>
    %16 = arith.select %14, %9, %15 : vector<8x128xi1>, vector<8x128xf32>
    %17 = math.log %12 : vector<8x1xf32>
    %18 = vector.shape_cast %17 : vector<8x1xf32> to vector<1x8x1xf32>
    %cst_4 = arith.constant dense<0.000000e+00> : vector<1xf32>
    %19 = vector.multi_reduction <add>, %18, %cst_4 [1, 2] : vector<1x8x1xf32> to vector<1xf32>
    %20 = vector.shape_cast %19 : vector<1xf32> to vector<1x1x1xf32>
    %21 = vector.extract %20[0, 0, 0] : f32 from vector<1x1x1xf32>
    %22 = vector.shape_cast %16 : vector<8x128xf32> to vector<1x8x128xf32>
    %cst_5 = arith.constant dense<0.000000e+00> : vector<1xf32>
    %23 = vector.multi_reduction <add>, %22, %cst_5 [1, 2] : vector<1x8x128xf32> to vector<1xf32>
    %24 = vector.shape_cast %23 : vector<1xf32> to vector<1x1x1xf32>
    %25 = vector.extract %24[0, 0, 0] : f32 from vector<1x1x1xf32>
    %26 = arith.subf %21, %25 : f32
    %cst_6 = arith.constant 1.250000e-01 : f32
    %27 = arith.mulf %26, %cst_6 : f32
    %28 = vector.broadcast %27 : f32 to vector<1x8x128xf32>
    %c0_7 = arith.constant 0 : index
    %c0_8 = arith.constant 0 : index
    %c0_9 = arith.constant 0 : index
    %29 = vector.load %arg3[%c0_7, %c0_8, %c0_9] : memref<1x8x128xf32, #tpu.memory_space<vmem>>, vector<1x8x128xf32>
    tpu.vector_store %arg3[%c0_7, %c0_8, %c0_9], %28 {strides = array<i32>} : memref<1x8x128xf32, #tpu.memory_space<vmem>>, vector<1x8x128xf32>,
    return
  }
  func.func @transform_0(%arg0: i32) -> (i32, i32) {
    %c0_i32 = arith.constant 0 : i32
    %c0_i32_0 = arith.constant 0 : i32
    return %arg0, %c0_i32 : i32, i32
  }
  func.func @transform_1(%arg0: i32) -> (i32, i32) {
    %c0_i32 = arith.constant 0 : i32
    %c0_i32_0 = arith.constant 0 : i32
    %c0_i32_1 = arith.constant 0 : i32
    return %c0_i32, %c0_i32_0 : i32, i32
  }
  func.func @transform_2(%arg0: i32) -> (i32, i32, i32) {
    %c0_i32 = arith.constant 0 : i32
    %c0_i32_0 = arith.constant 0 : i32
    %c0_i32_1 = arith.constant 0 : i32
    return %arg0, %c0_i32, %c0_i32_0 : i32, i32, i32
  }
}

</mosaic_0001>

<bundles_post_ra>
// kernel: tpu_custom_call.1
= control target key start
LH: loop header
LB: loop body
LE: loop exit
PB: predicated region body
PF: predicated region fallthrough
CT: control target
= control target key end

     0   :  { %s141_s0 = inlined_call_operand.vmem [shape: f32[8,128], index: 0, kind: input, shape index: {}]   ;;  %s142_s1 = inlined_call_operand.vmem [shape: s32[8,1], index: 1, kind: input, shape index: {}]   ;;  %s143_s2 = inlined_call_operand.hbm [shape: f32[1,8,128], index: 2, kind: output, shape index: {}]  }
   0x1   :  { %v12_v0 = vld [vmem:[%s141_s0] sm:$0xff] }
   0x2   :  { %v15_v1 = vld [vmem:[%s142_s1] sm:$0xff] }
   0x3   :  { %7 = vsyncpa [#allocation3], 0  ;;  %18 = vmax.xlane.f32.xlu0 %v12_v0  ;;  %v106_v2 = vmov 0   ;;  %v16_v6 = vlaneseq  ;;  %vm32_vm1 = vcmask 7168   ;;  %s107_s14 = smov [#allocation2]  }
   0x4   :  { %76 = vset.pattern.permute.xlu1 %v106_v2  ;;  %77 = vset.pattern.permute.xlu0 %v106_v2  ;;  %s62_s15 = sshll.u32 %s107_s14, 4  ;;  %s63_s15 = int_to_ptr.vmem [resolvable:$true] %s62_s15 }
   0x5   :  { %26 = vperm.xlu1 %76, %v15_v1   ;;  %v17_v7 = vand.u32 127, %v16_v6  ;;  %s82_s17 = scalar_lea.vmem %s63_s15, 128  ;;  %p87_p1 = scmp.lt.s32.totalorder %s63_s15, %s63_s15 }
   0x6   :  { %p83_p0 = scmp.ne.s32.totalorder %s63_s15, %s82_s17  ;;  %p88_p2 = scmp.lt.s32.totalorder %s82_s17, %s82_s17 }
   0x8   :  { %p89_p3 = por %p88_p2, %p87_p1 }
   0xa   :  { %p90_p4 = pnand %p89_p3, %p83_p0 }
  0x84   :  { %v27_v8 = vpop.permute.xlu1 %26 }
  0x85   :  { %vm28_vm0 = vcmp.eq.s32.totalorder %v17_v7, %v27_v8 }
  0x90   :  { %v19_v3 = vpop.xlane.xlu0 %18 }
  0x91   :  { %v20_v4 = vsub.f32 %v12_v0, %v19_v3 }
  0x93   :  { %v21_v5 = vmul.f32 1.442695, %v20_v4  ;;  %v29_v10 = vsel %vm28_vm0, %v20_v4, 0.0 }
  0x95   :  { %78 = vpow2.f32 %v21_v5 }
  0x9f   :  { %v79_v9 = vpop.eup %78 }
  0xa0   :  { %23 = vadd.xlane.f32.xlu0 %v79_v9 }
  0xa4   :  { %43 = vadd.xlane.f32.xlu0 %v29_v10 }
 0x12d   :  { %v24_v11 = vpop.xlane.xlu0 %23 }
 0x12e   :  { %80 = vlog2.f32 %v24_v11 }
 0x131   :  { %v44_v15 = vpop.xlane.xlu0 %43 }
 0x132   :  { %v45_v16 = vrot.slane %v44_v15, 4 }
 0x134   :  { %v46_v17 = vadd.f32 %v45_v16, %v44_v15 }
 0x136   :  { %v47_v18 = vrot.slane %v46_v17, 2 }
 0x138   :  { %v81_v12 = vpop.eup %80  ;;  %v48_v22 = vadd.f32 %v47_v18, %v46_v17 }
 0x139   :  { %v31_v13 = vmul.f32 0.6931472, %v81_v12 }
 0x13a   :  { %v49_v25 = vrot.slane %v48_v22, 1 }
 0x13b   :  { %v33_v14 = vsel %vm32_vm1, %v31_v13, 0.0 }
 0x13c   :  { %34 = vadd.xlane.f32.xlu1 %v33_v14  ;;  %v50_v28 = vadd.f32 %v49_v25, %v48_v22 }
 0x1c9   :  { %v35_v19 = vpop.xlane.xlu1 %34 }
 0x1ca   :  { %v36_v20 = vrot.slane %v35_v19, 4 }
 0x1cc   :  { %v37_v21 = vadd.f32 %v36_v20, %v35_v19 }
 0x1ce   :  { %v38_v23 = vrot.slane %v37_v21, 2 }
 0x1d0   :  { %v39_v24 = vadd.f32 %v38_v23, %v37_v21 }
 0x1d2   :  { %v40_v26 = vrot.slane %v39_v24, 1 }
 0x1d4   :  { %v41_v27 = vadd.f32 %v40_v26, %v39_v24 }
 0x1d6   :  { %70 = vpush %v41_v27 }
 0x1d7   :  { %72 = vpush %v50_v28 }
 0x207   :  { %s71_s0 = spop %70 }
 0x208   :  { %s73_s1 = spop %72 }
 0x209   :  { %s52_s13 = ssub.f32 %s71_s0, %s73_s1 }
 0x20b   :  { %s53_s16 = smul.f32 0.125, %s52_s13 }
 0x20d   :  { %v54_v29 = vstv %s53_s16 }
 0x20e   :  { %55 = vst [vmem:[#allocation2] sm:$0xff] %v54_v29 }
 0x20f   :  { %93 = shalt.err (!%p90_p4)
}
 0x210   :  { %s94_s20 = scalar_lea.hbm %s143_s2, 128 }
 0x211   :  { %p95_p5 = scmp.ne.s32.totalorder %s143_s2, %s94_s20  ;;  %p98_p6 = scmp.lt.u32.totalorder %s94_s20, %s143_s2 }
 0x213   :  { %p100_p7 = pnand %p98_p6, %p95_p5 }
 0x215   :  { %103 = shalt.err (!%p100_p7)
}
 0x216   :  { %65 = dma.vmem_to_hbm [thread:$0]  %s63_s15, 128, %s143_s2, [#allocation3]  }
 0x217   :  { %104 = dma.done.wait [#allocation3], 128  }
 0x218   :  { %105 = vsyncadd [#allocation3], 4294967168 }
 0x219   :  { %69 = vsyncpa [#allocation3], 1 }

</bundles_post_ra>
